<compile_context>
chip_gen: v7x
topology: tpu7x:2x2x1
jax: 0.10.0
libtpu: 0.0.40
codegen_flags: <defaults>
</compile_context>

<pallas_src>
import functools

import jax
import jax.numpy as jnp
from jax.experimental import pallas as pl
from jax.experimental.pallas import tpu as pltpu

HIDDEN = 24
LANES = 128
MAX_BATCH_TILE = 4096  # lane-dim tile cap; ~250 B/row -> ~1 MiB of VMEM at 4096 rows


def _round_up(x, m):
    return (x + m - 1) // m * m


def _cores_per_device():
    """Best-effort TensorCore count per JAX device (megacore sharding hint)."""
    try:
        kind = jax.devices()[0].device_kind.lower()
    except Exception:
        return 1
    if "lite" in kind or "v5e" in kind or "v6e" in kind:
        return 1
    if "v7" in kind or "v5p" in kind or "v4" in kind:
        return 2
    return 1


def _batch_tiling(batch, num_cores):
    """Pick (tile_b, grid_b) for the lane-resident batch dimension.

    Lane-dim blocks must be a multiple of 128 unless they span the full dim,
    so small batches use a single full-extent block, and larger batches use
    big 128-aligned tiles with a cdiv grid (ragged last block is masked by
    Pallas). On multi-core parts the tile is capped at cdiv(B, num_cores) so
    the "parallel" batch axis shards across TensorCores.
    """
    per_core = pl.cdiv(batch, max(num_cores, 1))
    tile = min(MAX_BATCH_TILE, _round_up(per_core, LANES))
    if tile >= batch:
        return batch, 1          # single full-extent block (always legal)
    return tile, pl.cdiv(batch, tile)


def critic_kernel(state_t_ref, action_t_ref, p_ref, o_ref, *, state_dim, action_dim):
    """One batch tile, batch along lanes.

    state_t_ref : [state_dim, TB]  (bf16 or f32)
    action_t_ref: [1, TB]          (bf16 or f32)
    p_ref       : [n_rows, 128]    f32 parameter slab (VMEM-resident)
    o_ref       : [action_dim, TB] f32
    """
    H = HIDDEN
    a_rows = _round_up(action_dim, 8)
    r_w1, r_w2, r_w3 = 0, H, 2 * H
    r_w1a = r_w3 + a_rows
    r_b1 = r_w1a + H
    r_b2 = r_b1 + H
    r_b3 = r_b2 + H

    # Upcast inputs immediately (v5e has no bf16 VPU/EUP); weights are f32.
    st = state_t_ref[...].astype(jnp.float32)    # [S, TB]
    ac = action_t_ref[...].astype(jnp.float32)   # [1, TB]

    # Static, 8-sublane-aligned views of the resident parameter slab.
    w1sT = p_ref[r_w1:r_w1 + H, 0:state_dim]     # [H, S]       = W1[:S, :]^T
    w2T = p_ref[r_w2:r_w2 + H, 0:H]              # [H, H]       = W2^T
    w3T = p_ref[r_w3:r_w3 + a_rows, 0:H]         # [a_rows, H]  rows >= A are 0
    w1a = p_ref[r_w1a:r_w1a + H, 0:1]            # [H, 1]       action column of W1
    b1 = p_ref[r_b1:r_b1 + H, 0:1]               # [H, 1]
    b2 = p_ref[r_b2:r_b2 + H, 0:1]               # [H, 1]
    b3 = p_ref[r_b3:r_b3 + action_dim, 0:1]      # [A, 1]

    # linear1 on cat([state, action]) without ever concatenating:
    #   W1s^T @ state^T (MXU)  +  w1a * action^T (VPU rank-1)  + b1
    h1 = jnp.dot(w1sT, st, preferred_element_type=jnp.float32)          # [H, TB]
    h1 = jnp.maximum(h1 + w1a * ac + b1, 0.0)
    h2 = jnp.maximum(jnp.dot(w2T, h1, preferred_element_type=jnp.float32) + b2, 0.0)
    q = jnp.dot(w3T, h2, preferred_element_type=jnp.float32)            # [a_rows, TB]
    o_ref[...] = (q[0:action_dim, :] + b3).astype(o_ref.dtype)


def pack_params(w1, b1, w2, b2, w3, b3, *, state_dim, action_dim):
    """Pack all parameters (pre-transposed) into one lane-dense f32 slab.

    Weights come in (in_features, out_features) layout (transposed vs the
    PyTorch `.weight` attribute). Row layout (x 128 lanes), every segment
    8-sublane aligned so all in-kernel slices are static aligned views:

      [0        , 24          )  W1_state^T  [24, state_dim]
      [24       , 48          )  W2^T        [24, 24]
      [48       , 48 + a_rows )  W3^T        [action_dim -> a_rows, 24]
      next 24 rows , lane 0     : w1_action  [24]  (action column of W1)
      next 24 rows , lane 0     : b1         [24]
      next 24 rows , lane 0     : b2         [24]
      next a_rows  , lane 0     : b3         [action_dim]
    """
    H = HIDDEN
    assert state_dim <= LANES and H <= LANES, "state_dim / hidden must fit in 128 lanes"
    a_rows = _round_up(action_dim, 8)
    r_w1, r_w2, r_w3 = 0, H, 2 * H
    r_w1a = r_w3 + a_rows
    r_b1 = r_w1a + H
    r_b2 = r_b1 + H
    r_b3 = r_b2 + H
    total = r_b3 + a_rows

    w1 = jnp.asarray(w1, jnp.float32)
    slab = jnp.zeros((total, LANES), jnp.float32)
    slab = slab.at[r_w1:r_w1 + H, 0:state_dim].set(w1[:state_dim, :].T)
    slab = slab.at[r_w2:r_w2 + H, 0:H].set(jnp.asarray(w2, jnp.float32).T)
    slab = slab.at[r_w3:r_w3 + action_dim, 0:H].set(jnp.asarray(w3, jnp.float32).T)
    slab = slab.at[r_w1a:r_w1a + H, 0].set(w1[state_dim, :])
    slab = slab.at[r_b1:r_b1 + H, 0].set(jnp.reshape(jnp.asarray(b1, jnp.float32), (H,)))
    slab = slab.at[r_b2:r_b2 + H, 0].set(jnp.reshape(jnp.asarray(b2, jnp.float32), (H,)))
    slab = slab.at[r_b3:r_b3 + action_dim, 0].set(
        jnp.reshape(jnp.asarray(b3, jnp.float32), (action_dim,)))
    return slab


def critic_forward(state, action, packed_params, *, state_dim, action_dim, batch_tile=None):
    """state: [B, state_dim], action: [B, 1] -> Q-values [B, action_dim] (f32)."""
    B = state.shape[0]
    n_rows = packed_params.shape[0]

    if batch_tile is None:
        tile_b, grid_b = _batch_tiling(B, _cores_per_device())
    else:
        tile_b = batch_tile if batch_tile < B else B
        if tile_b < B:
            tile_b = _round_up(tile_b, LANES)
        grid_b = pl.cdiv(B, tile_b)

    # Batch-on-lanes layout: transpose in the wrapper (layout plumbing only).
    state_t = jnp.transpose(state)      # [S, B]
    action_t = jnp.transpose(action)    # [1, B]

    kernel = functools.partial(critic_kernel, state_dim=state_dim, action_dim=action_dim)

    cost = pl.CostEstimate(
        flops=2 * B * HIDDEN * (state_dim + 1 + HIDDEN + action_dim) + 4 * B * HIDDEN,
        transcendentals=0,
        bytes_accessed=(state.size * state.dtype.itemsize
                        + action.size * action.dtype.itemsize
                        + packed_params.size * 4
                        + B * action_dim * 4),
    )

    out_t = pl.pallas_call(
        kernel,
        out_shape=jax.ShapeDtypeStruct((action_dim, B), jnp.float32),
        grid=(grid_b,),
        in_specs=[
            pl.BlockSpec((state_dim, tile_b), lambda i: (0, i)),
            pl.BlockSpec((1, tile_b), lambda i: (0, i)),
            # Constant index_map -> slab is DMA'd once and stays VMEM-resident.
            pl.BlockSpec((n_rows, LANES), lambda i: (0, 0)),
        ],
        out_specs=pl.BlockSpec((action_dim, tile_b), lambda i: (0, i)),
        compiler_params=pltpu.CompilerParams(dimension_semantics=("parallel",)),
        cost_estimate=cost,
    )(state_t, action_t, packed_params)

    return jnp.transpose(out_t)         # [B, action_dim]


def init_params(key, state_dim, action_dim):
    """PyTorch-style uniform(-1/sqrt(fan_in), 1/sqrt(fan_in)) init.

    Weights stored as (in_features, out_features); biases as (1, out_features).
    """
    dims = [(state_dim + 1, HIDDEN), (HIDDEN, HIDDEN), (HIDDEN, action_dim)]
    params = []
    for i, (fan_in, fan_out) in enumerate(dims):
        kw, kb = jax.random.split(jax.random.fold_in(key, i))
        bound = 1.0 / jnp.sqrt(jnp.float32(fan_in))
        w = jax.random.uniform(kw, (fan_in, fan_out), jnp.float32, -bound, bound)
        b = jax.random.uniform(kb, (1, fan_out), jnp.float32, -bound, bound)
        params += [w, b]
    return tuple(params)


def critic_reference(state, action, params):
    w1, b1, w2, b2, w3, b3 = params
    x = jnp.concatenate([state, action], axis=1)
    x = jax.nn.relu(x @ w1 + b1)
    x = jax.nn.relu(x @ w2 + b2)
    return x @ w3 + b3


if __name__ == "__main__":
    key = jax.random.PRNGKey(0)
    state_dim, action_dim = 4, 2

    k_s, k_a, k_p = jax.random.split(key, 3)
    params = init_params(k_p, state_dim, action_dim)
    packed = pack_params(*params, state_dim=state_dim, action_dim=action_dim)

    # (batch, batch_tile override). The (300, 128) case forces a multi-step
    # grid with a ragged, masked last block so that path is exercised on any
    # chip generation; the others use the auto (generation-aware) tiling.
    cases = [(8, None), (300, None), (300, 128)]
    for batch, tile in cases:
        ks = jax.random.fold_in(k_s, batch)
        ka = jax.random.fold_in(k_a, batch)
        # Inputs stored in bf16 (halves HBM traffic); the kernel upcasts to f32.
        state = jax.random.normal(ks, (batch, state_dim), jnp.float32).astype(jnp.bfloat16)
        action = jax.random.normal(ka, (batch, 1), jnp.float32).astype(jnp.bfloat16)

        out = critic_forward(state, action, packed,
                             state_dim=state_dim, action_dim=action_dim,
                             batch_tile=tile)
        out = jax.block_until_ready(out)

        # Reference sees the same bf16-quantized inputs promoted to f32, so
        # both paths do f32 math on identical values -> tight tolerance.
        ref = critic_reference(state.astype(jnp.float32), action.astype(jnp.float32), params)
        assert out.shape == (batch, action_dim)
        assert jnp.allclose(out, ref, atol=1e-4, rtol=1e-4), \
            f"mismatch vs JAX reference at batch={batch}, tile={tile}"

    print("KERNEL_OK")
</pallas_src>

<mosaic_0001>
module attributes {stable_mosaic.version = 11 : i64} {
  func.func @critic_kernel(%arg0: i32, %arg1: memref<4x8xbf16, #tpu.memory_space<vmem>>, %arg2: memref<1x8xbf16, #tpu.memory_space<vmem>>, %arg3: memref<136x128xf32, #tpu.memory_space<vmem>>, %arg4: memref<2x8xf32, #tpu.memory_space<vmem>>) attributes {dimension_semantics = [#tpu.dimension_semantics<parallel>], iteration_bounds = array<i64: 1>, scalar_prefetch = 0 : i64, scratch_operands = 0 : i64, tpu.core_type = #tpu.core_type<tc>, window_params = [{transform_indices = @transform_0, window_bounds = array<i64: 4, 8>}, {transform_indices = @transform_1, window_bounds = array<i64: 1, 8>}, {pipeline_mode = #tpu.pipeline_mode<synchronous>, transform_indices = @transform_2, window_bounds = array<i64: 136, 128>}, {transform_indices = @transform_3, window_bounds = array<i64: 2, 8>}]} {
    %c0 = arith.constant 0 : index
    %c0_0 = arith.constant 0 : index
    %0 = vector.load %arg1[%c0, %c0_0] : memref<4x8xbf16, #tpu.memory_space<vmem>>, vector<4x8xbf16>
    %1 = arith.extf %0 : vector<4x8xbf16> to vector<4x8xf32>
    %c0_1 = arith.constant 0 : index
    %c0_2 = arith.constant 0 : index
    %2 = vector.load %arg2[%c0_1, %c0_2] : memref<1x8xbf16, #tpu.memory_space<vmem>>, vector<1x8xbf16>
    %3 = arith.extf %2 : vector<1x8xbf16> to vector<1x8xf32>
    %c0_3 = arith.constant 0 : index
    %c0_4 = arith.constant 0 : index
    %4 = vector.load %arg3[%c0_3, %c0_4] : memref<136x128xf32, #tpu.memory_space<vmem>>, vector<24x4xf32>
    %c24 = arith.constant 24 : index
    %c0_5 = arith.constant 0 : index
    %5 = vector.load %arg3[%c24, %c0_5] : memref<136x128xf32, #tpu.memory_space<vmem>>, vector<24x24xf32>
    %c48 = arith.constant 48 : index
    %c0_6 = arith.constant 0 : index
    %6 = vector.load %arg3[%c48, %c0_6] : memref<136x128xf32, #tpu.memory_space<vmem>>, vector<8x24xf32>
    %c56 = arith.constant 56 : index
    %c0_7 = arith.constant 0 : index
    %7 = vector.load %arg3[%c56, %c0_7] : memref<136x128xf32, #tpu.memory_space<vmem>>, vector<24x1xf32>
    %c80 = arith.constant 80 : index
    %c0_8 = arith.constant 0 : index
    %8 = vector.load %arg3[%c80, %c0_8] : memref<136x128xf32, #tpu.memory_space<vmem>>, vector<24x1xf32>
    %c104 = arith.constant 104 : index
    %c0_9 = arith.constant 0 : index
    %9 = vector.load %arg3[%c104, %c0_9] : memref<136x128xf32, #tpu.memory_space<vmem>>, vector<24x1xf32>
    %c128 = arith.constant 128 : index
    %c0_10 = arith.constant 0 : index
    %10 = vector.load %arg3[%c128, %c0_10] : memref<136x128xf32, #tpu.memory_space<vmem>>, vector<2x1xf32>
    %cst = arith.constant dense<0.000000e+00> : vector<24x8xf32>
    %11 = tpu.matmul %4, %1, %cst {dimension_numbers = #tpu.dot_dimension_numbers<[1], [0], [0], [1], [0, 0, 1, 1], [], []>} : vector<24x4xf32>, vector<4x8xf32>, vector<24x8xf32> -> vector<24x8xf32>
    %12 = vector.broadcast %7 : vector<24x1xf32> to vector<24x8xf32>
    %13 = vector.broadcast %3 : vector<1x8xf32> to vector<24x8xf32>
    %14 = arith.mulf %12, %13 : vector<24x8xf32>
    %15 = arith.addf %11, %14 : vector<24x8xf32>
    %16 = vector.broadcast %8 : vector<24x1xf32> to vector<24x8xf32>
    %17 = arith.addf %15, %16 : vector<24x8xf32>
    %cst_11 = arith.constant 0.000000e+00 : f32
    %18 = vector.broadcast %cst_11 : f32 to vector<24x8xf32>
    %19 = arith.maximumf %17, %18 : vector<24x8xf32>
    %cst_12 = arith.constant dense<0.000000e+00> : vector<24x8xf32>
    %20 = tpu.matmul %5, %19, %cst_12 {dimension_numbers = #tpu.dot_dimension_numbers<[1], [0], [0], [1], [0, 0, 1, 1], [], []>} : vector<24x24xf32>, vector<24x8xf32>, vector<24x8xf32> -> vector<24x8xf32>
    %21 = vector.broadcast %9 : vector<24x1xf32> to vector<24x8xf32>
    %22 = arith.addf %20, %21 : vector<24x8xf32>
    %cst_13 = arith.constant 0.000000e+00 : f32
    %23 = vector.broadcast %cst_13 : f32 to vector<24x8xf32>
    %24 = arith.maximumf %22, %23 : vector<24x8xf32>
    %cst_14 = arith.constant dense<0.000000e+00> : vector<8x8xf32>
    %25 = tpu.matmul %6, %24, %cst_14 {dimension_numbers = #tpu.dot_dimension_numbers<[1], [0], [0], [1], [0, 0, 1, 1], [], []>} : vector<8x24xf32>, vector<24x8xf32>, vector<8x8xf32> -> vector<8x8xf32>
    %26 = vector.extract_strided_slice %25 {offsets = [0, 0], sizes = [2, 8], strides = [1, 1]} : vector<8x8xf32> to vector<2x8xf32>
    %27 = vector.broadcast %10 : vector<2x1xf32> to vector<2x8xf32>
    %28 = arith.addf %26, %27 : vector<2x8xf32>
    %c0_15 = arith.constant 0 : index
    %c0_16 = arith.constant 0 : index
    %29 = vector.load %arg4[%c0_15, %c0_16] : memref<2x8xf32, #tpu.memory_space<vmem>>, vector<2x8xf32>
    tpu.vector_store %arg4[%c0_15, %c0_16], %28 {strides = array<i32>} : memref<2x8xf32, #tpu.memory_space<vmem>>, vector<2x8xf32>,
    return
  }
  func.func @transform_0(%arg0: i32) -> (i32, i32) {
    %c0_i32 = arith.constant 0 : i32
    %c0_i32_0 = arith.constant 0 : i32
    return %c0_i32, %arg0 : i32, i32
  }
  func.func @transform_1(%arg0: i32) -> (i32, i32) {
    %c0_i32 = arith.constant 0 : i32
    %c0_i32_0 = arith.constant 0 : i32
    return %c0_i32, %arg0 : i32, i32
  }
  func.func @transform_2(%arg0: i32) -> (i32, i32) {
    %c0_i32 = arith.constant 0 : i32
    %c0_i32_0 = arith.constant 0 : i32
    %c0_i32_1 = arith.constant 0 : i32
    return %c0_i32, %c0_i32_0 : i32, i32
  }
  func.func @transform_3(%arg0: i32) -> (i32, i32) {
    %c0_i32 = arith.constant 0 : i32
    %c0_i32_0 = arith.constant 0 : i32
    return %c0_i32, %arg0 : i32, i32
  }
}

</mosaic_0001>

<bundles_post_ra>
// kernel: tpu_custom_call.1
= control target key start
LH: loop header
LB: loop body
LE: loop exit
PB: predicated region body
PF: predicated region fallthrough
CT: control target
= control target key end

     0   :  { %8 = vsyncpa [#allocation3], 0  ;;  %s649_s0 = inlined_call_operand.hbm [shape: bf16[4,8], index: 0, kind: input, shape index: {}]   ;;  %s650_s1 = inlined_call_operand.vmem [shape: bf16[1,8], index: 1, kind: input, shape index: {}]   ;;  %s651_s2 = inlined_call_operand.hbm [shape: f32[136,128], index: 2, kind: input, shape index: {}]   ;;  %s652_s3 = inlined_call_operand.hbm [shape: f32[2,8], index: 3, kind: output, shape index: {}]  }
   0x1   :  { %9 = vsyncpa [#allocation6], 0 }
   0x2   :  { %10 = vsyncpa [#allocation4], 0  ;;  %s550_s12 = smov [#allocation2]   ;;  %s551_s14 = smov [#allocation5]  }
   0x3   :  { %s17_s13 = sshll.u32 %s550_s12, 4  ;;  %s28_s15 = sshll.u32 %s551_s14, 4  ;;  %s18_s13 = int_to_ptr.vmem [resolvable:$true] %s17_s13  ;;  %s579_s15 = int_to_ptr.vmem [resolvable:$true] %s28_s15 }
   0x4   :  { %s478_s18 = scalar_lea.hbm %s649_s0, 32 }
   0x5   :  { %p479_p0 = scmp.ne.s32.totalorder %s649_s0, %s478_s18  ;;  %p482_p1 = scmp.lt.u32.totalorder %s478_s18, %s649_s0 }
   0x7   :  { %p484_p2 = pnand %p482_p1, %p479_p0 }
   0x9   :  { %487 = shalt.err (!%p484_p2)
}
   0xa   :  { %s488_s23 = scalar_lea.vmem %s18_s13, 32  ;;  %p493_p4 = scmp.lt.s32.totalorder %s18_s13, %s18_s13 }
   0xb   :  { %p489_p3 = scmp.ne.s32.totalorder %s18_s13, %s488_s23  ;;  %p494_p5 = scmp.lt.s32.totalorder %s488_s23, %s488_s23 }
   0xd   :  { %p495_p6 = por %p494_p5, %p493_p4 }
   0xf   :  { %p496_p7 = pnand %p495_p6, %p489_p3 }
  0x11   :  { %499 = shalt.err (!%p496_p7)
}
  0x12   :  { %20 = dma.hbm_to_vmem [thread:$0]  %s649_s0, 32, %s18_s13, [#allocation3]  }
  0x13   :  { %s500_s28 = scalar_lea.hbm %s651_s2, 2176 }
  0x14   :  { %p501_p8 = scmp.ne.s32.totalorder %s651_s2, %s500_s28  ;;  %p504_p9 = scmp.lt.u32.totalorder %s500_s28, %s651_s2 }
  0x16   :  { %p506_p10 = pnand %p504_p9, %p501_p8 }
  0x18   :  { %509 = shalt.err (!%p506_p10)
}
  0x19   :  { %s510_s6 = scalar_lea.vmem %s579_s15, 2176  ;;  %p515_p12 = scmp.lt.s32.totalorder %s579_s15, %s579_s15 }
  0x1a   :  { %p511_p11 = scmp.ne.s32.totalorder %s579_s15, %s510_s6  ;;  %p516_p13 = scmp.lt.s32.totalorder %s510_s6, %s510_s6 }
  0x1c   :  { %p517_p0 = por %p516_p13, %p515_p12 }
  0x1e   :  { %p518_p1 = pnand %p517_p0, %p511_p11 }
  0x20   :  { %521 = shalt.err (!%p518_p1)
}
  0x21   :  { %s552_s0 = smov 128   ;;  %s553_s7 = smov 8  }
  0x22   :  { %34 = dma.hbm_to_vmem [thread:$0]  %s651_s2, 2176, %s579_s15, [#allocation6], %s552_s0, %s552_s0, %s553_s7  }
  0x23   :  { %544 = dma.done.wait [#allocation3], 32  }
  0x24   :  { %545 = vsyncadd [#allocation3], 4294967264 }
  0x25   :  { %546 = dma.done.wait [#allocation6], 2176  }
  0x26   :  { %547 = vsyncadd [#allocation6], 4294965120  ;;  %v554_v0 = vmov 0.0   ;;  %vm555_vm0 = vmmov 0   ;;  %v556_v1 = vmov 0   ;;  %vm94_vm1 = vcmask 1043456  }
  0x27   :  { %426 = vmatprep.subr.mxu0 %v554_v0  ;;  %428 = vmatprep.mubr.msk.f32.mxu0 %vm555_vm0, %v554_v0  ;;  %v41_v2 = vld [vmem:[#allocation2] sm:$0x3]  ;;  %v45_v4 = vld [vmem:[#allocation5] sm:$0xff]  ;;  %vm84_vm2 = vcmask 31744   ;;  %v55_v6 = vld [vmem:[#allocation5 + $0x50] sm:$0xff]  ;;  %v557_v17 = vmov 0.0|0.0   ;;  %v77_v18 = vlaneseq }
  0x28   :  { %476 = vset.pattern.permute.xlu0 %v556_v1  ;;  %477 = vset.pattern.permute.xlu1 %v556_v1  ;;  %v42_v3 = vunpack.c.l.bf16 %v41_v2  ;;  %v52_v5 = vld [vmem:[#allocation5 + $0x38] sm:$0xff]  ;;  %v53_v7 = vld [vmem:[#allocation5 + $0x40] sm:$0xff]  ;;  %v46_v9 = vld [vmem:[#allocation5 + $0x8] sm:$0xff]  ;;  %vm214_vm3 = vcmask 195584   ;;  %vm386_vm4 = vcmask 58368  }
  0x29   :  { %443 = vmatprep.mubr.msk.f32.mxu1 %vm555_vm0, %v554_v0  ;;  %64 = vperm.xlu0 %476, %v52_v5   ;;  %v56_v8 = vld [vmem:[#allocation5 + $0x58] sm:$0xff]  ;;  %v54_v10 = vld [vmem:[#allocation5 + $0x48] sm:$0xff]  ;;  %v57_v11 = vld [vmem:[#allocation5 + $0x60] sm:$0xff]  ;;  %v78_v19 = vshrl.u32 %v77_v18, 7 }
  0x2a   :  { %180 = vperm.xlu1 %477, %v55_v6   ;;  %427 = vmatpush3.msk.msra.mxu0 %vm94_vm1, %v42_v3  ;;  %v47_v12 = vld [vmem:[#allocation5 + $0x10] sm:$0xff]  ;;  %v58_v13 = vld [vmem:[#allocation5 + $0x68] sm:$0xff]  ;;  %v60_v15 = vld [vmem:[#allocation5 + $0x78] sm:$0xff] }
  0x2b   :  { %429 = vmatmul.mubr.msk.f32.vlgmr.msra.gmra.mrb[0].mxu0 %vm84_vm2, %v45_v4  ;;  %v59_v14 = vld [vmem:[#allocation5 + $0x70] sm:$0xff]  ;;  %v61_v16 = vld [vmem:[#allocation5 + $0x80] sm:$0x3]  ;;  %461 = vmatprep.subr.bf16.mxu1 %v557_v17  ;;  %v43_v20 = vld [vmem:[%s650_s1] sm:$0x1]  ;;  %v79_v21 = vsub.s32 0, %v78_v19 }
  0x2c   :  { %431 = vmatprep.mubr.msk.f32.mxu0 %vm555_vm0, %v554_v0  ;;  %464 = vmatprep.subr.bf16.mxu0 %v557_v17  ;;  %v44_v22 = vunpack.c.l.bf16 %v43_v20  ;;  %v48_v49 = vld [vmem:[#allocation5 + $0x18] sm:$0xff]  ;;  %v49_v50 = vld [vmem:[#allocation5 + $0x20] sm:$0xff]  ;;  %v50_v51 = vld [vmem:[#allocation5 + $0x28] sm:$0xff]  ;;  %s558_s1 = smov [#allocation7]  }
  0x2d   :  { %69 = vperm.xlu0 %476, %v53_v7   ;;  %v51_v5 = vld [vmem:[#allocation5 + $0x30] sm:$0xff]  ;;  %s394_s11 = sshll.u32 %s558_s1, 4  ;;  %s395_s11 = int_to_ptr.vmem [resolvable:$true] %s394_s11 }
  0x2e   :  { %185 = vperm.xlu1 %477, %v56_v8   ;;  %v80_v23 = vrot.slane %v44_v22, %v79_v21  ;;  %s522_s12 = scalar_lea.vmem %s395_s11, 32  ;;  %p527_p3 = scmp.lt.s32.totalorder %s395_s11, %s395_s11 }
  0x2f   :  { %432 = vmatmul.mubr.msk.f32.gmra.mrb[2].mxu0 %vm84_vm2, %v46_v9  ;;  %p523_p2 = scmp.ne.s32.totalorder %s395_s11, %s522_s12  ;;  %p528_p4 = scmp.lt.s32.totalorder %s522_s12, %s522_s12 }
  0x30   :  { %434 = vmatprep.mubr.msk.f32.mxu0 %vm555_vm0, %v554_v0 }
  0x31   :  { %74 = vperm.xlu0 %476, %v54_v10   ;;  %p529_p5 = por %p528_p4, %p527_p3 }
  0x32   :  { %190 = vperm.xlu1 %477, %v57_v11  }
  0x33   :  { %435 = vmatmul.mubr.msk.f32.gmra.mrb[4].mxu0 %vm84_vm2, %v47_v12  ;;  %p530_p6 = pnand %p529_p5, %p523_p2 }
  0x34   :  { %458 = vmatprep.mubr.msk.f32.mxu0 %vm555_vm0, %v554_v0 }
  0x35   :  { %201 = vperm.xlu0 %476, %v58_v13  }
  0x36   :  { %206 = vperm.xlu1 %477, %v59_v14  }
  0x39   :  { %211 = vperm.xlu0 %476, %v60_v15  }
  0x3a   :  { %382 = vperm.xlu1 %477, %v61_v16  }
  0xa8   :  { %v65_v24 = vpop.permute.xlu0 %64 }
  0xa9   :  { %v81_v25 = vmul.f32 %v80_v23, %v65_v24  ;;  %v181_v26 = vpop.permute.xlu1 %180 }
  0xac   :  { %v70_v27 = vpop.permute.xlu0 %69 }
  0xad   :  { %v82_v31 = vmul.f32 %v80_v23, %v70_v27  ;;  %v186_v32 = vpop.permute.xlu1 %185 }
  0xb0   :  { %v75_v37 = vpop.permute.xlu0 %74 }
  0xb1   :  { %v83_v38 = vmul.f32 %v80_v23, %v75_v37  ;;  %v191_v45 = vpop.permute.xlu1 %190 }
  0xb4   :  { %v202_v54 = vpop.permute.xlu0 %201 }
  0xb5   :  { %v207_v56 = vpop.permute.xlu1 %206 }
  0xb8   :  { %v212_v62 = vpop.permute.xlu0 %211 }
  0xb9   :  { %v383_v6 = vpop.permute.xlu1 %382 }
  0xfe   :  { %v164_v28 = vpop.f32.mrb[0].mxu0 }
  0xff   :  { %v165_v29 = vadd.f32 %v164_v28, %v81_v25  ;;  %v430_v30 = vpop.f32.mrb[1].mxu0 }
 0x101   :  { %v193_v34 = vadd.f32 %v181_v26, %v165_v29 }
 0x102   :  { %v169_v33 = vpop.f32.mrb[2].mxu0 }
 0x103   :  { %v170_v35 = vadd.f32 %v169_v33, %v82_v31  ;;  %v433_v36 = vpop.f32.mrb[3].mxu0  ;;  %v196_v41 = vmax.f32 %v193_v34, 0.0 }
 0x105   :  { %v194_v39 = vadd.f32 %v186_v32, %v170_v35 }
 0x106   :  { %v174_v40 = vpop.f32.mrb[4].mxu0 }
 0x107   :  { %v197_v42 = vmax.f32 %v194_v39, 0.0  ;;  %v175_v43 = vadd.f32 %v174_v40, %v83_v38  ;;  %v436_v44 = vpop.f32.mrb[5].mxu0 }
 0x109   :  { %v195_v46 = vadd.f32 %v191_v45, %v175_v43  ;;  %v462_v47 = vpack.c.bf16 %v197_v42, %v196_v41 }
 0x10b   :  { %463 = vmatpush3.bf16.msra.mxu1 %v462_v47  ;;  %v198_v48 = vmax.f32 %v195_v46, 0.0 }
 0x10c   :  { %441 = vmatprep.subr.mxu1 %v554_v0 }
 0x10f   :  { %442 = vmatpush3.msra.mxu1 %v198_v48 }
 0x110   :  { %444 = vmatmul.mubr.msk.f32.vlgmr.msra.gmra.mrb[0].mxu1 %vm214_vm3, %v48_v49 }
 0x111   :  { %446 = vmatprep.mubr.msk.f32.mxu1 %vm555_vm0, %v554_v0 }
 0x114   :  { %447 = vmatmul.mubr.msk.f32.gmra.mrb[2].mxu1 %vm214_vm3, %v49_v50 }
 0x115   :  { %449 = vmatprep.mubr.msk.f32.mxu1 %vm555_vm0, %v554_v0 }
 0x118   :  { %450 = vmatmul.mubr.msk.f32.gmra.mrb[4].mxu1 %vm214_vm3, %v50_v51 }
 0x1e3   :  { %v290_v52 = vpop.f32.mrb[0].mxu1 }
 0x1e4   :  { %v445_v53 = vpop.f32.mrb[1].mxu1  ;;  %v291_v55 = vadd.f32 %v290_v52, %v202_v54 }
 0x1e6   :  { %v304_v60 = vmax.f32 %v291_v55, 0.0 }
 0x1e7   :  { %v295_v57 = vpop.f32.mrb[2].mxu1 }
 0x1e8   :  { %v296_v58 = vadd.f32 %v295_v57, %v207_v56  ;;  %v448_v59 = vpop.f32.mrb[3].mxu1 }
 0x1ea   :  { %v305_v61 = vmax.f32 %v296_v58, 0.0 }
 0x1eb   :  { %v300_v63 = vpop.f32.mrb[4].mxu1 }
 0x1ec   :  { %v465_v1 = vpack.c.bf16 %v305_v61, %v304_v60  ;;  %v301_v2 = vadd.f32 %v300_v63, %v212_v62  ;;  %v451_v3 = vpop.f32.mrb[5].mxu1 }
 0x1ee   :  { %466 = vmatpush3.bf16.msra.mxu0 %v465_v1  ;;  %v306_v4 = vmax.f32 %v301_v2, 0.0 }
 0x1ef   :  { %456 = vmatprep.subr.mxu0 %v554_v0 }
 0x1f2   :  { %457 = vmatpush3.msra.mxu0 %v306_v4 }
 0x1f3   :  { %459 = vmatmul.mubr.msk.f32.vlgmr.msra.gmra.mrb[6].mxu0 %vm214_vm3, %v51_v5 }
 0x2c6   :  { %v376_v7 = vpop.f32.mrb[6].mxu0 }
 0x2c7   :  { %v385_v8 = vadd.f32 %v383_v6, %v376_v7  ;;  %v460_v9 = vpop.f32.mrb[7].mxu0 }
 0x2c9   :  { %387 = vst.msk [vmem:[#allocation7] sm:$0x3] %vm386_vm4, %v385_v8 }
 0x2ca   :  { %533 = shalt.err (!%p530_p6)
}
 0x2cb   :  { %s534_s15 = scalar_lea.hbm %s652_s3, 32 }
 0x2cc   :  { %p535_p7 = scmp.ne.s32.totalorder %s652_s3, %s534_s15  ;;  %p538_p8 = scmp.lt.u32.totalorder %s534_s15, %s652_s3 }
 0x2ce   :  { %p540_p9 = pnand %p538_p8, %p535_p7 }
 0x2d0   :  { %543 = shalt.err (!%p540_p9)
}
 0x2d1   :  { %397 = dma.vmem_to_hbm [thread:$0]  %s395_s11, 32, %s652_s3, [#allocation4]  }
 0x2d2   :  { %548 = dma.done.wait [#allocation4], 32  }
 0x2d3   :  { %549 = vsyncadd [#allocation4], 4294967264 }
 0x2d4   :  { %401 = vsyncpa [#allocation3], 1 }
 0x2d5   :  { %402 = vsyncpa [#allocation6], 1 }
 0x2d6   :  { %403 = vsyncpa [#allocation4], 1 }

</bundles_post_ra>
